<compile_context>
chip_gen: v6e
topology: v6e:2x2x1
jax: 0.10.0
libtpu: 0.0.40
codegen_flags: <defaults>
</compile_context>

<pallas_src>
import jax
import jax.numpy as jnp
from jax.experimental import pallas as pl
from jax.experimental.pallas import tpu as pltpu

LANE = 128          # vreg / MXU lane width
SUBLANE_BF16 = 16   # bf16 packs 16 rows per sublane group


def _round_up(n, m):
    return ((n + m - 1) // m) * m


def _cdiv(a, b):
    return (a + b - 1) // b


def actor_critic_kernel(x_ref, w1_ref, b1_ref, w2_ref, b2_ref, wh_ref, bh_ref,
                        out_ref):
    """One batch tile: x -> fc1+ReLU -> fc2+ReLU -> fused [policy | value] head."""
    x = x_ref[...].astype(w1_ref.dtype)      # f32 -> bf16 cast in-kernel (VPU)
    # fc1 + ReLU (bf16 MXU operands, f32 accumulation / epilogue)
    h1 = jnp.dot(x, w1_ref[...], preferred_element_type=jnp.float32) + b1_ref[...]
    h1 = jnp.maximum(h1, 0.0)
    # fc2 + ReLU
    h2 = jnp.dot(h1.astype(w2_ref.dtype), w2_ref[...],
                 preferred_element_type=jnp.float32) + b2_ref[...]
    h2 = jnp.maximum(h2, 0.0)
    # fused policy+value head -> lane-dense 128-wide output slab, stored bf16
    out = jnp.dot(h2.astype(wh_ref.dtype), wh_ref[...],
                  preferred_element_type=jnp.float32) + bh_ref[...]
    out_ref[...] = out.astype(out_ref.dtype)


def init_params(key, state_dim, action_dim, hidden_size):
    """Deterministic synthetic init with PyTorch nn.Linear shapes (out, in)/(out,)."""
    ks = jax.random.split(key, 8)

    def lin(kw, kb, fan_in, fan_out):
        bound = 1.0 / jnp.sqrt(jnp.float32(fan_in))
        w = jax.random.uniform(kw, (fan_out, fan_in), jnp.float32, -bound, bound)
        b = jax.random.uniform(kb, (fan_out,), jnp.float32, -bound, bound)
        return w, b

    fc1_w, fc1_b = lin(ks[0], ks[1], state_dim, hidden_size)
    fc2_w, fc2_b = lin(ks[2], ks[3], hidden_size, hidden_size)
    policy_w, policy_b = lin(ks[4], ks[5], hidden_size, action_dim)
    value_w, value_b = lin(ks[6], ks[7], hidden_size, 1)
    return dict(fc1_w=fc1_w, fc1_b=fc1_b, fc2_w=fc2_w, fc2_b=fc2_b,
                policy_w=policy_w, policy_b=policy_b,
                value_w=value_w, value_b=value_b)


def prepare_params(params, state_dim, action_dim, hidden_size,
                   compute_dtype=jnp.bfloat16):
    """Transpose to (in, out), fuse heads, zero-pad hidden/head dims to 128-multiples."""
    h_pad = _round_up(hidden_size, LANE)
    p_pad = _round_up(action_dim + 1, LANE)

    def pad2(a, rows, cols):
        return jnp.pad(a, ((0, rows - a.shape[0]), (0, cols - a.shape[1])))

    # fc1 keeps its real input-dim rows (no 128-lane padding of the K dim).
    w1 = pad2(params["fc1_w"].T, state_dim, h_pad).astype(compute_dtype)
    b1 = pad2(params["fc1_b"][None, :], 1, h_pad).astype(jnp.float32)
    w2 = pad2(params["fc2_w"].T, h_pad, h_pad).astype(compute_dtype)
    b2 = pad2(params["fc2_b"][None, :], 1, h_pad).astype(jnp.float32)
    # Fused head: columns = [policy logits | value], zero-padded to p_pad lanes.
    wh = jnp.concatenate([params["policy_w"].T, params["value_w"].T], axis=1)
    bh = jnp.concatenate([params["policy_b"], params["value_b"]], axis=0)[None, :]
    wh = pad2(wh, h_pad, p_pad).astype(compute_dtype)
    bh = pad2(bh, 1, p_pad).astype(jnp.float32)
    return dict(w1=w1, b1=b1, w2=w2, b2=b2, wh=wh, bh=bh, dims=(h_pad, p_pad))


def actor_critic_forward(x, prepped, action_dim, *, max_tile=1024):
    """x: (B, state_dim) f32. Returns (logits (B, A), value (B, 1)) in f32."""
    B, state_dim = x.shape
    h_pad, p_pad = prepped["dims"]

    # Adaptive batch tiling: minimal padding (bf16 sublane granularity), and at
    # least 2 grid steps when B is big enough so v7x's 2 TCs both get work.
    num_tiles = _cdiv(B, max_tile)
    if num_tiles == 1 and B > 2 * SUBLANE_BF16:
        num_tiles = 2
    tb = _round_up(_cdiv(B, num_tiles), SUBLANE_BF16)
    b_pad = num_tiles * tb

    xq = x if b_pad == B else jnp.pad(x, ((0, b_pad - B), (0, 0)))

    flops = 2 * b_pad * (state_dim * h_pad + h_pad * h_pad + h_pad * p_pad)
    bytes_accessed = (
        b_pad * state_dim * 4
        + sum(prepped[k].size * prepped[k].dtype.itemsize
              for k in ("w1", "b1", "w2", "b2", "wh", "bh"))
        + b_pad * p_pad * 2)

    const = lambda shape: pl.BlockSpec(shape, lambda i: (0, 0))

    out = pl.pallas_call(
        actor_critic_kernel,
        out_shape=jax.ShapeDtypeStruct((b_pad, p_pad), jnp.bfloat16),
        grid=(num_tiles,),
        in_specs=[
            # x tile: last block dim == full array dim (state_dim), so no lane
            # padding is required; per-grid-step batch slice (double-buffered).
            pl.BlockSpec((tb, state_dim), lambda i: (i, 0)),
            const((state_dim, h_pad)), const((1, h_pad)),   # fc1 (VMEM-resident)
            const((h_pad, h_pad)), const((1, h_pad)),        # fc2 (VMEM-resident)
            const((h_pad, p_pad)), const((1, p_pad)),        # fused head (resident)
        ],
        out_specs=pl.BlockSpec((tb, p_pad), lambda i: (i, 0)),
        compiler_params=pltpu.CompilerParams(
            dimension_semantics=("parallel",)),
        cost_estimate=pl.CostEstimate(flops=flops, transcendentals=0,
                                      bytes_accessed=bytes_accessed),
    )(xq, prepped["w1"], prepped["b1"], prepped["w2"], prepped["b2"],
      prepped["wh"], prepped["bh"])

    out = out.astype(jnp.float32)
    logits = out[:B, :action_dim]
    value = out[:B, action_dim:action_dim + 1]
    return logits, value


def reference_forward(x, params):
    """Pure-JAX reference, quantizing MXU operands to bf16 exactly as the kernel does."""
    q = lambda a: a.astype(jnp.bfloat16).astype(jnp.float32)
    h1 = jnp.maximum(q(x) @ q(params["fc1_w"].T) + params["fc1_b"], 0.0)
    h2 = jnp.maximum(q(h1) @ q(params["fc2_w"].T) + params["fc2_b"], 0.0)
    logits = q(h2) @ q(params["policy_w"].T) + params["policy_b"]
    value = q(h2) @ q(params["value_w"].T) + params["value_b"]
    return logits, value


if __name__ == "__main__":
    B, state_dim, action_dim, hidden_size = 2, 8, 4, 32

    key = jax.random.PRNGKey(0)
    k_x, k_p = jax.random.split(key)
    x = jax.random.normal(k_x, (B, state_dim), jnp.float32)
    params = init_params(k_p, state_dim, action_dim, hidden_size)
    prepped = prepare_params(params, state_dim, action_dim, hidden_size)

    logits, value = actor_critic_forward(x, prepped, action_dim)
    logits = jax.block_until_ready(logits)
    value = jax.block_until_ready(value)

    ref_logits, ref_value = reference_forward(x, params)
    assert logits.shape == (B, action_dim) and value.shape == (B, 1)
    assert jnp.allclose(logits, ref_logits, atol=1e-2, rtol=1e-2)
    assert jnp.allclose(value, ref_value, atol=1e-2, rtol=1e-2)

    print("KERNEL_OK")
</pallas_src>

<mosaic_0001>
module attributes {stable_mosaic.version = 11 : i64} {
  func.func @actor_critic_kernel(%arg0: i32, %arg1: memref<16x8xf32, #tpu.memory_space<vmem>>, %arg2: memref<8x128xbf16, #tpu.memory_space<vmem>>, %arg3: memref<1x128xf32, #tpu.memory_space<vmem>>, %arg4: memref<128x128xbf16, #tpu.memory_space<vmem>>, %arg5: memref<1x128xf32, #tpu.memory_space<vmem>>, %arg6: memref<128x128xbf16, #tpu.memory_space<vmem>>, %arg7: memref<1x128xf32, #tpu.memory_space<vmem>>, %arg8: memref<16x128xbf16, #tpu.memory_space<vmem>>) attributes {dimension_semantics = [#tpu.dimension_semantics<parallel>], iteration_bounds = array<i64: 1>, scalar_prefetch = 0 : i64, scratch_operands = 0 : i64, tpu.core_type = #tpu.core_type<tc>, window_params = [{transform_indices = @transform_0, window_bounds = array<i64: 16, 8>}, {pipeline_mode = #tpu.pipeline_mode<synchronous>, transform_indices = @transform_1, window_bounds = array<i64: 8, 128>}, {pipeline_mode = #tpu.pipeline_mode<synchronous>, transform_indices = @transform_2, window_bounds = array<i64: 1, 128>}, {pipeline_mode = #tpu.pipeline_mode<synchronous>, transform_indices = @transform_3, window_bounds = array<i64: 128, 128>}, {pipeline_mode = #tpu.pipeline_mode<synchronous>, transform_indices = @transform_4, window_bounds = array<i64: 1, 128>}, {pipeline_mode = #tpu.pipeline_mode<synchronous>, transform_indices = @transform_5, window_bounds = array<i64: 128, 128>}, {pipeline_mode = #tpu.pipeline_mode<synchronous>, transform_indices = @transform_6, window_bounds = array<i64: 1, 128>}, {transform_indices = @transform_7, window_bounds = array<i64: 16, 128>}]} {
    %c0 = arith.constant 0 : index
    %c0_0 = arith.constant 0 : index
    %0 = vector.load %arg1[%c0, %c0_0] : memref<16x8xf32, #tpu.memory_space<vmem>>, vector<16x8xf32>
    %1 = arith.truncf %0 : vector<16x8xf32> to vector<16x8xbf16>
    %c0_1 = arith.constant 0 : index
    %c0_2 = arith.constant 0 : index
    %2 = vector.load %arg2[%c0_1, %c0_2] : memref<8x128xbf16, #tpu.memory_space<vmem>>, vector<8x128xbf16>
    %cst = arith.constant dense<0.000000e+00> : vector<16x128xf32>
    %3 = tpu.matmul %1, %2, %cst {dimension_numbers = #tpu.dot_dimension_numbers<[1], [0], [0], [1], [0, 0, 1, 1], [], []>} : vector<16x8xbf16>, vector<8x128xbf16>, vector<16x128xf32> -> vector<16x128xf32>
    %c0_3 = arith.constant 0 : index
    %c0_4 = arith.constant 0 : index
    %4 = vector.load %arg3[%c0_3, %c0_4] : memref<1x128xf32, #tpu.memory_space<vmem>>, vector<1x128xf32>
    %5 = vector.broadcast %4 : vector<1x128xf32> to vector<16x128xf32>
    %6 = arith.addf %3, %5 : vector<16x128xf32>
    %cst_5 = arith.constant 0.000000e+00 : f32
    %7 = vector.broadcast %cst_5 : f32 to vector<16x128xf32>
    %8 = arith.maximumf %6, %7 : vector<16x128xf32>
    %9 = arith.truncf %8 : vector<16x128xf32> to vector<16x128xbf16>
    %c0_6 = arith.constant 0 : index
    %c0_7 = arith.constant 0 : index
    %10 = vector.load %arg4[%c0_6, %c0_7] : memref<128x128xbf16, #tpu.memory_space<vmem>>, vector<128x128xbf16>
    %cst_8 = arith.constant dense<0.000000e+00> : vector<16x128xf32>
    %11 = tpu.matmul %9, %10, %cst_8 {dimension_numbers = #tpu.dot_dimension_numbers<[1], [0], [0], [1], [0, 0, 1, 1], [], []>} : vector<16x128xbf16>, vector<128x128xbf16>, vector<16x128xf32> -> vector<16x128xf32>
    %c0_9 = arith.constant 0 : index
    %c0_10 = arith.constant 0 : index
    %12 = vector.load %arg5[%c0_9, %c0_10] : memref<1x128xf32, #tpu.memory_space<vmem>>, vector<1x128xf32>
    %13 = vector.broadcast %12 : vector<1x128xf32> to vector<16x128xf32>
    %14 = arith.addf %11, %13 : vector<16x128xf32>
    %cst_11 = arith.constant 0.000000e+00 : f32
    %15 = vector.broadcast %cst_11 : f32 to vector<16x128xf32>
    %16 = arith.maximumf %14, %15 : vector<16x128xf32>
    %17 = arith.truncf %16 : vector<16x128xf32> to vector<16x128xbf16>
    %c0_12 = arith.constant 0 : index
    %c0_13 = arith.constant 0 : index
    %18 = vector.load %arg6[%c0_12, %c0_13] : memref<128x128xbf16, #tpu.memory_space<vmem>>, vector<128x128xbf16>
    %cst_14 = arith.constant dense<0.000000e+00> : vector<16x128xf32>
    %19 = tpu.matmul %17, %18, %cst_14 {dimension_numbers = #tpu.dot_dimension_numbers<[1], [0], [0], [1], [0, 0, 1, 1], [], []>} : vector<16x128xbf16>, vector<128x128xbf16>, vector<16x128xf32> -> vector<16x128xf32>
    %c0_15 = arith.constant 0 : index
    %c0_16 = arith.constant 0 : index
    %20 = vector.load %arg7[%c0_15, %c0_16] : memref<1x128xf32, #tpu.memory_space<vmem>>, vector<1x128xf32>
    %21 = vector.broadcast %20 : vector<1x128xf32> to vector<16x128xf32>
    %22 = arith.addf %19, %21 : vector<16x128xf32>
    %23 = arith.truncf %22 : vector<16x128xf32> to vector<16x128xbf16>
    %c0_17 = arith.constant 0 : index
    %c0_18 = arith.constant 0 : index
    %24 = vector.load %arg8[%c0_17, %c0_18] : memref<16x128xbf16, #tpu.memory_space<vmem>>, vector<16x128xbf16>
    tpu.vector_store %arg8[%c0_17, %c0_18], %23 {strides = array<i32>} : memref<16x128xbf16, #tpu.memory_space<vmem>>, vector<16x128xbf16>,
    return
  }
  func.func @transform_0(%arg0: i32) -> (i32, i32) {
    %c0_i32 = arith.constant 0 : i32
    %c0_i32_0 = arith.constant 0 : i32
    return %arg0, %c0_i32 : i32, i32
  }
  func.func @transform_1(%arg0: i32) -> (i32, i32) {
    %c0_i32 = arith.constant 0 : i32
    %c0_i32_0 = arith.constant 0 : i32
    %c0_i32_1 = arith.constant 0 : i32
    return %c0_i32, %c0_i32_0 : i32, i32
  }
  func.func @transform_2(%arg0: i32) -> (i32, i32) {
    %c0_i32 = arith.constant 0 : i32
    %c0_i32_0 = arith.constant 0 : i32
    %c0_i32_1 = arith.constant 0 : i32
    return %c0_i32, %c0_i32_0 : i32, i32
  }
  func.func @transform_3(%arg0: i32) -> (i32, i32) {
    %c0_i32 = arith.constant 0 : i32
    %c0_i32_0 = arith.constant 0 : i32
    %c0_i32_1 = arith.constant 0 : i32
    return %c0_i32, %c0_i32_0 : i32, i32
  }
  func.func @transform_4(%arg0: i32) -> (i32, i32) {
    %c0_i32 = arith.constant 0 : i32
    %c0_i32_0 = arith.constant 0 : i32
    %c0_i32_1 = arith.constant 0 : i32
    return %c0_i32, %c0_i32_0 : i32, i32
  }
  func.func @transform_5(%arg0: i32) -> (i32, i32) {
    %c0_i32 = arith.constant 0 : i32
    %c0_i32_0 = arith.constant 0 : i32
    %c0_i32_1 = arith.constant 0 : i32
    return %c0_i32, %c0_i32_0 : i32, i32
  }
  func.func @transform_6(%arg0: i32) -> (i32, i32) {
    %c0_i32 = arith.constant 0 : i32
    %c0_i32_0 = arith.constant 0 : i32
    %c0_i32_1 = arith.constant 0 : i32
    return %c0_i32, %c0_i32_0 : i32, i32
  }
  func.func @transform_7(%arg0: i32) -> (i32, i32) {
    %c0_i32 = arith.constant 0 : i32
    %c0_i32_0 = arith.constant 0 : i32
    return %arg0, %c0_i32 : i32, i32
  }
}

</mosaic_0001>

<bundles_post_ra>
// kernel: tpu_custom_call.1
= control target key start
LH: loop header
LB: loop body
LE: loop exit
PB: predicated region body
PF: predicated region fallthrough
CT: control target
= control target key end

     0   :  { %12 = vsyncpa [#allocation3], 0  ;;  %s664_s0 = inlined_call_operand.vmem [shape: f32[16,8], index: 0, kind: input, shape index: {}]   ;;  %s665_s1 = inlined_call_operand.vmem [shape: bf16[8,128], index: 1, kind: input, shape index: {}]   ;;  %s666_s2 = inlined_call_operand.vmem [shape: f32[1,128], index: 2, kind: input, shape index: {}]   ;;  %s667_s3 = inlined_call_operand.hbm [shape: bf16[128,128], index: 3, kind: input, shape index: {}]   ;;  %s668_s4 = inlined_call_operand.vmem [shape: f32[1,128], index: 4, kind: input, shape index: {}]   ;;  %s669_s5 = inlined_call_operand.hbm [shape: bf16[128,128], index: 5, kind: input, shape index: {}]   ;;  %s670_s6 = inlined_call_operand.vmem [shape: f32[1,128], index: 6, kind: input, shape index: {}]   ;;  %s671_s7 = inlined_call_operand.hbm [shape: bf16[16,128], index: 7, kind: output, shape index: {}]  }
   0x1   :  { %13 = vsyncpa [#allocation6], 0 }
   0x2   :  { %14 = vsyncpa [#allocation4], 0  ;;  %s558_s24 = smov [#allocation2]  }
   0x3   :  { %s26_s25 = sshll.u32 %s558_s24, 4  ;;  %s27_s25 = int_to_ptr.vmem [resolvable:$true] %s26_s25 }
   0x4   :  { %s500_s26 = scalar_lea.vmem %s27_s25, 1024  ;;  %p505_p1 = scmp.lt.s32.totalorder %s27_s25, %s27_s25 }
   0x5   :  { %p501_p0 = scmp.ne.s32.totalorder %s27_s25, %s500_s26  ;;  %p506_p2 = scmp.lt.s32.totalorder %s500_s26, %s500_s26 }
   0x7   :  { %p507_p3 = por %p506_p2, %p505_p1 }
   0x9   :  { %p508_p4 = pnand %p507_p3, %p501_p0 }
   0xb   :  { %511 = shalt.err (!%p508_p4)
}
   0xc   :  { %s559_s27 = smov 64   ;;  %s560_s28 = smov 4  }
   0xd   :  { %32 = dma.hbm_to_vmem [thread:$0]  %s667_s3, 1024, %s27_s25, [#allocation3], %s559_s27, %s559_s27, %s560_s28  }
   0xe   :  { %s561_s8 = smov [#allocation5]  }
   0xf   :  { %s40_s9 = sshll.u32 %s561_s8, 4  ;;  %s41_s9 = int_to_ptr.vmem [resolvable:$true] %s40_s9 }
  0x10   :  { %s520_s10 = scalar_lea.vmem %s41_s9, 1024  ;;  %p525_p6 = scmp.lt.s32.totalorder %s41_s9, %s41_s9 }
  0x11   :  { %p521_p5 = scmp.ne.s32.totalorder %s41_s9, %s520_s10  ;;  %p526_p7 = scmp.lt.s32.totalorder %s520_s10, %s520_s10 }
  0x13   :  { %p527_p8 = por %p526_p7, %p525_p6 }
  0x15   :  { %p528_p9 = pnand %p527_p8, %p521_p5 }
  0x17   :  { %531 = shalt.err (!%p528_p9)
}
  0x18   :  { %46 = dma.hbm_to_vmem [thread:$0]  %s669_s5, 1024, %s41_s9, [#allocation6], %s559_s27, %s559_s27, %s560_s28  }
  0x19   :  { %552 = dma.done.wait [#allocation3], 1024  }
  0x1a   :  { %553 = vsyncadd [#allocation3], 4294966272 }
  0x1b   :  { %554 = dma.done.wait [#allocation6], 1024  }
  0x1c   :  { %555 = vsyncadd [#allocation6], 4294966272  ;;  %v562_v0 = vmov 0.0   ;;  %vm563_vm0 = vmmov 0   ;;  %vm71_vm1 = vcmask 1043456   ;;  %v56_v2 = vld [vmem:[%s664_s0] sm:$0xff] }
  0x1d   :  { %423 = vmatprep.subr.bf16.mxu0 %v562_v0  ;;  %425 = vmatprep.mubr.msk.bf16.mxu0 %vm563_vm0, %v562_v0  ;;  %v59_v1 = vld [vmem:[%s665_s1] sm:$0xf]  ;;  %v57_v3 = vld [vmem:[%s664_s0 + $0x8] sm:$0xff]  ;;  %v476_v6 = vld [vmem:[#allocation2 + $0x38] sm:$0xff]   ;;  %vm67_vm2 = vcmask 64512   ;;  %s564_s20 = smov [#allocation7]  }
  0x1e   :  { %429 = vmatprep.subr.bf16.mxu1 %v562_v0  ;;  %445 = vmatprep.mubr.msk.bf16.mxu1 %vm563_vm0, %v562_v0  ;;  %v73_v4 = vsel %vm71_vm1, %v59_v1, 0  ;;  %v58_v5 = vpack.c.bf16 %v57_v3, %v56_v2  ;;  %v477_v7 = vld [vmem:[#allocation2 + $0x30] sm:$0xff]   ;;  %v478_v8 = vld [vmem:[#allocation2 + $0x28] sm:$0xff]   ;;  %v479_v9 = vld [vmem:[#allocation2 + $0x20] sm:$0xff]   ;;  %s361_s21 = sshll.u32 %s564_s20, 4  ;;  %s362_s21 = int_to_ptr.vmem [resolvable:$true] %s361_s21 }
  0x1f   :  { %424 = vmatpush3.bf16.msra.mxu0 %v73_v4  ;;  %430 = vmatpush3.bf16.msra.mxu1 %v476_v6  ;;  %v480_v10 = vld [vmem:[#allocation2 + $0x18] sm:$0xff]   ;;  %v481_v11 = vld [vmem:[#allocation2 + $0x10] sm:$0xff]   ;;  %v482_v12 = vld [vmem:[#allocation2 + $0x8] sm:$0xff]   ;;  %p537_p11 = scmp.lt.s32.totalorder %s362_s21, %s362_s21 }
  0x20   :  { %449 = vmatprep.subr.bf16.mxu0 %v562_v0  ;;  %431 = vmatprep.subr.bf16.mxu1 %v562_v0  ;;  %v483_v13 = vld [vmem:[#allocation2] sm:$0xff]   ;;  %v484_v14 = vld [vmem:[#allocation5 + $0x38] sm:$0xff]   ;;  %v485_v15 = vld [vmem:[#allocation5 + $0x30] sm:$0xff]  }
  0x21   :  { %v486_v16 = vld [vmem:[#allocation5 + $0x28] sm:$0xff]   ;;  %v487_v17 = vld [vmem:[#allocation5 + $0x20] sm:$0xff]   ;;  %v488_v18 = vld [vmem:[#allocation5 + $0x18] sm:$0xff]  }
  0x22   :  { %426 = vmatmul.mubr.msk.bf16.vlgmr.msra.gmra.mxu0 %vm67_vm2, %v58_v5  ;;  %v374_v19 = vld [vmem:[%s666_s2] ss:$0 sm:$0xff]  ;;  %v489_v29 = vld [vmem:[#allocation5 + $0x10] sm:$0xff]   ;;  %v490_v30 = vld [vmem:[#allocation5 + $0x8] sm:$0xff]  }
  0x23   :  { %465 = vmatprep.mubr.msk.bf16.mxu0 %vm563_vm0, %v562_v0  ;;  %432 = vmatpush3.bf16.msra.mxu1 %v477_v7  ;;  %v491_v31 = vld [vmem:[#allocation5] sm:$0xff]  }
  0x24   :  { %433 = vmatprep.subr.bf16.mxu1 %v562_v0  ;;  %450 = vmatpush3.bf16.msra.mxu0 %v484_v14  ;;  %v376_v32 = vld [vmem:[%s668_s4] ss:$0 sm:$0xff]  ;;  %s532_s4 = scalar_lea.vmem %s362_s21, 128 }
  0x25   :  { %451 = vmatprep.subr.bf16.mxu0 %v562_v0  ;;  %v385_v43 = vld [vmem:[%s670_s6] ss:$0 sm:$0xff]  ;;  %p533_p10 = scmp.ne.s32.totalorder %s362_s21, %s532_s4  ;;  %p538_p12 = scmp.lt.s32.totalorder %s532_s4, %s532_s4 }
  0x27   :  { %434 = vmatpush3.bf16.msra.mxu1 %v478_v8  ;;  %p539_p13 = por %p538_p12, %p537_p11 }
  0x28   :  { %435 = vmatprep.subr.bf16.mxu1 %v562_v0  ;;  %452 = vmatpush3.bf16.msra.mxu0 %v485_v15 }
  0x29   :  { %453 = vmatprep.subr.bf16.mxu0 %v562_v0  ;;  %p540_p0 = pnand %p539_p13, %p533_p10 }
  0x2b   :  { %436 = vmatpush3.bf16.msra.mxu1 %v479_v9 }
  0x2c   :  { %437 = vmatprep.subr.bf16.mxu1 %v562_v0  ;;  %454 = vmatpush3.bf16.msra.mxu0 %v486_v16 }
  0x2d   :  { %455 = vmatprep.subr.bf16.mxu0 %v562_v0 }
  0x2f   :  { %438 = vmatpush3.bf16.msra.mxu1 %v480_v10 }
  0x30   :  { %439 = vmatprep.subr.bf16.mxu1 %v562_v0  ;;  %456 = vmatpush3.bf16.msra.mxu0 %v487_v17 }
  0x31   :  { %457 = vmatprep.subr.bf16.mxu0 %v562_v0 }
  0x33   :  { %440 = vmatpush3.bf16.msra.mxu1 %v481_v11 }
  0x34   :  { %441 = vmatprep.subr.bf16.mxu1 %v562_v0  ;;  %458 = vmatpush3.bf16.msra.mxu0 %v488_v18 }
  0x35   :  { %459 = vmatprep.subr.bf16.mxu0 %v562_v0 }
  0x37   :  { %442 = vmatpush3.bf16.msra.mxu1 %v482_v12 }
  0x38   :  { %443 = vmatprep.subr.bf16.mxu1 %v562_v0  ;;  %460 = vmatpush3.bf16.msra.mxu0 %v489_v29 }
  0x39   :  { %461 = vmatprep.subr.bf16.mxu0 %v562_v0 }
  0x3b   :  { %444 = vmatpush3.bf16.msra.mxu1 %v483_v13 }
  0x3c   :  { %462 = vmatpush3.bf16.msra.mxu0 %v490_v30 }
  0x3d   :  { %463 = vmatprep.subr.bf16.mxu0 %v562_v0 }
  0x40   :  { %464 = vmatpush3.bf16.msra.mxu0 %v491_v31 }
  0xe2   :  { %v109_v20 = vpop.f32.mrf.mxu0 }
  0xe3   :  { %v110_v22 = vadd.f32 %v374_v19, %v109_v20 }
  0xe4   :  { %v427_v21 = vpop.f32.mrf.mxu0 }
  0xe5   :  { %v116_v26 = vmax.f32 %v110_v22, 0.0 }
  0xe6   :  { %v112_v23 = vpop.f32.mrf.mxu0 }
  0xe7   :  { %v113_v24 = vadd.f32 %v374_v19, %v112_v23 }
  0xe8   :  { %v428_v25 = vpop.f32.mrf.mxu0 }
  0xe9   :  { %v117_v27 = vmax.f32 %v113_v24, 0.0 }
  0xeb   :  { %v118_v28 = vpack.c.bf16 %v117_v27, %v116_v26 }
  0xed   :  { %446 = vmatmul.mubr.bf16.vlgmr.msra.gmra.mxu1 %v118_v28 }
 0x1ad   :  { %v224_v33 = vpop.f32.mrf.mxu1 }
 0x1ae   :  { %v225_v35 = vadd.f32 %v376_v32, %v224_v33 }
 0x1af   :  { %v447_v34 = vpop.f32.mrf.mxu1 }
 0x1b0   :  { %v231_v39 = vmax.f32 %v225_v35, 0.0 }
 0x1b1   :  { %v227_v36 = vpop.f32.mrf.mxu1 }
 0x1b2   :  { %v228_v37 = vadd.f32 %v376_v32, %v227_v36 }
 0x1b3   :  { %v448_v38 = vpop.f32.mrf.mxu1 }
 0x1b4   :  { %v232_v40 = vmax.f32 %v228_v37, 0.0 }
 0x1b6   :  { %v233_v41 = vpack.c.bf16 %v232_v40, %v231_v39 }
 0x1b8   :  { %466 = vmatmul.mubr.bf16.vlgmr.msra.gmra.mxu0 %v233_v41 }
 0x278   :  { %v339_v42 = vpop.f32.mrf.mxu0 }
 0x279   :  { %v340_v46 = vadd.f32 %v385_v43, %v339_v42 }
 0x27a   :  { %v467_v44 = vpop.f32.mrf.mxu0 }
 0x27c   :  { %v342_v45 = vpop.f32.mrf.mxu0 }
 0x27d   :  { %v343_v47 = vadd.f32 %v385_v43, %v342_v45 }
 0x27e   :  { %v468_v48 = vpop.f32.mrf.mxu0 }
 0x27f   :  { %v401_v49 = vpack.c.bf16 %v343_v47, %v340_v46 }
 0x281   :  { %402 = vst [vmem:[#allocation7] sm:$0xff] %v401_v49  }
 0x282   :  { %543 = shalt.err (!%p540_p0)
}
 0x283   :  { %367 = dma.vmem_to_hbm [thread:$0]  %s362_s21, 128, %s671_s7, [#allocation4], %s559_s27, %s559_s27, %s560_s28  }
 0x284   :  { %556 = dma.done.wait [#allocation4], 128  }
 0x285   :  { %557 = vsyncadd [#allocation4], 4294967168 }
 0x286   :  { %371 = vsyncpa [#allocation3], 1 }
 0x287   :  { %372 = vsyncpa [#allocation6], 1 }
 0x288   :  { %373 = vsyncpa [#allocation4], 1 }

</bundles_post_ra>
